<compile_context>
chip_gen: v6e
topology: v6e:2x2x1
jax: 0.10.0
libtpu: 0.0.40
codegen_flags: <defaults>
</compile_context>

<pallas_src>
import numpy as np
import jax
import jax.numpy as jnp
from jax import lax
from jax.experimental import pallas as pl
from jax.experimental.pallas import tpu as pltpu

EPS = 1e-12  # F.normalize default eps


# --------------------------------------------------------------------------- kernel
def mlp_proj_kernel(x_ref, w1_ref, b1_ref, w2_ref, b2_ref, o_ref, acc_ref):
    # x_ref:   (tb, in_pad)   compute dtype (bf16)
    # w1_ref:  (in_pad, tk)   compute dtype   -- hidden chunk k of fc1 weights
    # b1_ref:  (1, tk)        f32
    # w2_ref:  (tk, dim_pad)  compute dtype   -- hidden chunk k of fc2 weights
    # b2_ref:  (1, dim_pad)   f32
    # o_ref:   (tb, dim_pad)  out dtype
    # acc_ref: (tb, dim_pad)  f32 scratch (fc2 accumulator across hidden chunks)
    k = pl.program_id(1)

    # fc1 chunk + ReLU (bf16 MXU matmul, f32 accumulate; ReLU is elementwise per
    # hidden chunk, so chunking the hidden dim is exact).
    h = jnp.dot(x_ref[...], w1_ref[...], preferred_element_type=jnp.float32)
    h = jnp.maximum(h + b1_ref[...], 0.0)

    # fc2 chunk, accumulated in f32 (set on first chunk, add afterwards).
    contrib = jnp.dot(h.astype(w2_ref.dtype), w2_ref[...],
                      preferred_element_type=jnp.float32)

    @pl.when(k == 0)
    def _():
        acc_ref[...] = contrib

    @pl.when(k > 0)
    def _():
        acc_ref[...] += contrib

    # finalize: fc2 bias, L2-normalize (single EUP rsqrt), lane-dense store.
    @pl.when(k == pl.num_programs(1) - 1)
    def _():
        y = acc_ref[...] + b2_ref[...]
        sumsq = jnp.sum(y * y, axis=-1, keepdims=True)
        inv = lax.rsqrt(jnp.maximum(sumsq, EPS * EPS))  # == 1 / max(||y||, EPS)
        o_ref[...] = (y * inv).astype(o_ref.dtype)


# --------------------------------------------------------------------------- helpers
def _round_up(x, m):
    return (x + m - 1) // m * m


def _pad2d(a, shape, dtype):
    """Zero-pad/cast a 2-D array; no copy when already the right shape/dtype."""
    if tuple(a.shape) == tuple(shape) and a.dtype == dtype:
        return a
    out = jnp.zeros(shape, dtype)
    return out.at[:a.shape[0], :a.shape[1]].set(a.astype(dtype))


def prepare_params(w1, b1, w2, b2, compute_dtype=jnp.bfloat16):
    """Pad weights/biases to 128-lane multiples and cast weights to the MXU compute
    dtype ONCE (call at module init / cache per set of weights).  Padded hidden units
    produce ReLU(0+0)=0 and padded output columns are exactly 0, so results match the
    unpadded math; padding here keeps it off the per-forward HBM path."""
    in_dim = w1.shape[0]
    dim = w2.shape[1]
    in_pad = _round_up(in_dim, 128)
    dim_pad = _round_up(dim, 128)
    return dict(
        w1=_pad2d(w1, (in_pad, in_pad), compute_dtype),
        b1=_pad2d(b1.reshape(1, -1), (1, in_pad), jnp.float32),
        w2=_pad2d(w2, (in_pad, dim_pad), compute_dtype),
        b2=_pad2d(b2.reshape(1, -1), (1, dim_pad), jnp.float32),
        in_dim=in_dim, dim=dim, compute_dtype=compute_dtype,
    )


def _vmem_policy():
    """Per-TensorCore VMEM capacity -> (vmem_limit cap, two-core-like flag)."""
    try:
        cap = int(pltpu.get_tpu_info().vmem_capacity_bytes)
    except Exception:
        cap = 64 * 2**20  # conservative default (v7x per-TC VMEM)
    vmem_limit_cap = max(16 * 2**20, min(cap - 8 * 2**20, (cap * 3) // 4))
    two_core_like = cap <= 64 * 2**20  # v7x proxy: 64 MiB/TC, 2 TCs/chip
    return vmem_limit_cap, two_core_like


# --------------------------------------------------------------------------- wrapper
def mlp_projection_prepared(x, params, *, tile_b=None):
    """x: (B, in_dim); params: output of prepare_params(). Returns (B, dim) in x.dtype."""
    in_dim, dim = params["in_dim"], params["dim"]
    w1p, b1p, w2p, b2p = params["w1"], params["b1"], params["w2"], params["b2"]
    compute_dtype = params["compute_dtype"]
    in_pad, dim_pad = w1p.shape[1], w2p.shape[1]

    B = x.shape[0]
    out_dtype = x.dtype
    c_itm = np.dtype(compute_dtype).itemsize
    o_itm = np.dtype(out_dtype).itemsize

    vmem_limit_cap, two_core_like = _vmem_policy()

    # ---- batch tiling (16-row multiples; bf16 packs 16 sublanes/vreg) -------------
    if tile_b is None:
        if B <= 16:
            tile_b = _round_up(max(B, 1), 16)
        elif two_core_like:
            # >=2 batch tiles so the "parallel" axis shards across both v7x TCs,
            # while keeping tiles <=256 under the 64 MiB/TC budget.
            tile_b = min(256, _round_up(-(-B // 2), 16))
        else:
            # single TC, big VMEM: large tiles amortize any weight streaming.
            tile_b = min(512, _round_up(B, 16))
    tile_b = max(16, _round_up(tile_b, 16))
    B_pad = _round_up(max(B, 1), tile_b)
    n_btiles = B_pad // tile_b

    # ---- hidden (K) tiling: prefer fully-resident weights (nk == 1) ---------------
    # Non-weight VMEM footprint (double-buffered x/out tiles, f32 accumulator, biases).
    fixed = (2 * tile_b * in_pad * c_itm
             + 2 * tile_b * dim_pad * o_itm
             + tile_b * dim_pad * 4
             + 4 * (in_pad + dim_pad) * 4)
    # Weight blocks are double-buffered by the pipeline -> per-copy budget is half of
    # what remains under the generation-aware VMEM cap.
    weight_budget = max((vmem_limit_cap - fixed - 2 * 2**20) // 2, 2 * 2**20)

    # tk: largest divisor of in_pad under budget, multiple of 256 when possible
    # (full-depth feed for v6e/v7x's 2x256x256 MXU, minimal nk / grid steps).
    step = 256 if in_pad % 256 == 0 else 128
    tk = None
    for cand in range(in_pad, 0, -step):
        if in_pad % cand == 0 and (in_pad * cand + cand * dim_pad) * c_itm <= weight_budget:
            tk = cand
            break
    if tk is None:
        tk = step  # smallest aligned chunk; vmem_limit_cap headroom covers it
    nk = in_pad // tk

    # ---- input padding/cast (weights were prepared once, outside this call) -------
    if (B_pad, in_pad) != (B, in_dim) or x.dtype != compute_dtype:
        xp = jnp.zeros((B_pad, in_pad), compute_dtype).at[:B, :in_dim].set(
            x.astype(compute_dtype))
    else:
        xp = x

    # ---- VMEM limit & cost estimate for the final tiling choice -------------------
    needed = fixed + 2 * (in_pad * tk + tk * dim_pad) * c_itm
    vmem_limit = int(min(vmem_limit_cap, max(16 * 2**20, needed + 4 * 2**20)))

    w_read_factor = n_btiles if nk > 1 else 1  # weights re-streamed per batch tile
    cost = pl.CostEstimate(
        flops=int(2 * B_pad * in_pad * (in_pad + dim_pad)),
        transcendentals=int(B_pad),
        bytes_accessed=int(xp.size * c_itm
                           + w_read_factor * (w1p.size + w2p.size) * c_itm
                           + (b1p.size + b2p.size) * 4
                           + B_pad * dim_pad * o_itm))

    out = pl.pallas_call(
        mlp_proj_kernel,
        out_shape=jax.ShapeDtypeStruct((B_pad, dim_pad), out_dtype),
        grid_spec=pltpu.PrefetchScalarGridSpec(
            num_scalar_prefetch=0,
            grid=(n_btiles, nk),
            in_specs=[
                pl.BlockSpec((tile_b, in_pad), lambda i, k: (i, 0)),   # x tile
                pl.BlockSpec((in_pad, tk), lambda i, k: (0, k)),       # fc1 W chunk
                pl.BlockSpec((1, tk), lambda i, k: (0, k)),            # fc1 b chunk
                pl.BlockSpec((tk, dim_pad), lambda i, k: (k, 0)),      # fc2 W chunk
                pl.BlockSpec((1, dim_pad), lambda i, k: (0, 0)),       # fc2 b
            ],
            out_specs=pl.BlockSpec((tile_b, dim_pad), lambda i, k: (i, 0)),
            scratch_shapes=[pltpu.VMEM((tile_b, dim_pad), jnp.float32)],
        ),
        compiler_params=pltpu.CompilerParams(
            dimension_semantics=("parallel", "arbitrary"),
            vmem_limit_bytes=vmem_limit),
        cost_estimate=cost,
    )(xp, w1p, b1p, w2p, b2p)

    return out[:B, :dim]


def mlp_projection(x, w1, b1, w2, b2, *, tile_b=None, compute_dtype=jnp.bfloat16):
    """Convenience path: prepares (pads/casts) params then runs the kernel.  For
    repeated forwards, call prepare_params() once and use mlp_projection_prepared."""
    params = prepare_params(w1, b1, w2, b2, compute_dtype)
    return mlp_projection_prepared(x, params, tile_b=tile_b)


# --------------------------------------------------------------------------- demo
def _torch_linear_init(key, fan_in, fan_out, dtype=jnp.float32):
    """nn.Linear-style init: U(-1/sqrt(fan_in), 1/sqrt(fan_in)); W returned as
       (fan_in, fan_out), i.e. already transposed for x @ W."""
    kw, kb = jax.random.split(key)
    bound = 1.0 / np.sqrt(fan_in)
    w = jax.random.uniform(kw, (fan_in, fan_out), dtype, -bound, bound)
    b = jax.random.uniform(kb, (fan_out,), dtype, -bound, bound)
    return w, b


if __name__ == "__main__":
    key = jax.random.PRNGKey(0)
    k_x, k_fc1, k_fc2 = jax.random.split(key, 3)

    batch, in_dim, dim = 8, 32, 128

    x = jax.random.normal(k_x, (batch, in_dim), jnp.float32)
    w1, b1 = _torch_linear_init(k_fc1, in_dim, in_dim)
    w2, b2 = _torch_linear_init(k_fc2, in_dim, dim)

    # Pad/cast the weights once (init-time), then run the fused kernel.
    params = prepare_params(w1, b1, w2, b2)
    out = jax.block_until_ready(mlp_projection_prepared(x, params))

    # Pure-JAX f32 reference (kernel runs bf16 on the MXU -> loosened tolerance).
    h_ref = jnp.maximum(x @ w1 + b1, 0.0)
    y_ref = h_ref @ w2 + b2
    ref = y_ref / jnp.maximum(
        jnp.sqrt(jnp.sum(y_ref * y_ref, axis=-1, keepdims=True)), EPS)

    assert out.shape == (batch, dim)
    err = float(jnp.max(jnp.abs(out.astype(jnp.float32) - ref)))
    assert err < 2e-2, f"max abs error {err}"

    print("KERNEL_OK")
</pallas_src>

<mosaic_0001>
module attributes {stable_mosaic.version = 11 : i64} {
  func.func @mlp_proj_kernel(%arg0: i32, %arg1: i32, %arg2: memref<16x128xbf16, #tpu.memory_space<vmem>>, %arg3: memref<128x128xbf16, #tpu.memory_space<vmem>>, %arg4: memref<1x128xf32, #tpu.memory_space<vmem>>, %arg5: memref<128x128xbf16, #tpu.memory_space<vmem>>, %arg6: memref<1x128xf32, #tpu.memory_space<vmem>>, %arg7: memref<16x128xf32, #tpu.memory_space<vmem>>, %arg8: memref<16x128xf32, #tpu.memory_space<vmem>>) attributes {dimension_semantics = [#tpu.dimension_semantics<parallel>, #tpu.dimension_semantics<arbitrary>], iteration_bounds = array<i64: 1, 1>, scalar_prefetch = 0 : i64, scratch_operands = 1 : i64, tpu.core_type = #tpu.core_type<tc>, window_params = [{transform_indices = @transform_0, window_bounds = array<i64: 16, 128>}, {transform_indices = @transform_1, window_bounds = array<i64: 128, 128>}, {transform_indices = @transform_2, window_bounds = array<i64: 1, 128>}, {transform_indices = @transform_3, window_bounds = array<i64: 128, 128>}, {pipeline_mode = #tpu.pipeline_mode<synchronous>, transform_indices = @transform_4, window_bounds = array<i64: 1, 128>}, {transform_indices = @transform_5, window_bounds = array<i64: 16, 128>}]} {
    %c0 = arith.constant 0 : index
    %c0_0 = arith.constant 0 : index
    %0 = vector.load %arg2[%c0, %c0_0] : memref<16x128xbf16, #tpu.memory_space<vmem>>, vector<16x128xbf16>
    %c0_1 = arith.constant 0 : index
    %c0_2 = arith.constant 0 : index
    %1 = vector.load %arg3[%c0_1, %c0_2] : memref<128x128xbf16, #tpu.memory_space<vmem>>, vector<128x128xbf16>
    %cst = arith.constant dense<0.000000e+00> : vector<16x128xf32>
    %2 = tpu.matmul %0, %1, %cst {dimension_numbers = #tpu.dot_dimension_numbers<[1], [0], [0], [1], [0, 0, 1, 1], [], []>} : vector<16x128xbf16>, vector<128x128xbf16>, vector<16x128xf32> -> vector<16x128xf32>
    %c0_3 = arith.constant 0 : index
    %c0_4 = arith.constant 0 : index
    %3 = vector.load %arg4[%c0_3, %c0_4] : memref<1x128xf32, #tpu.memory_space<vmem>>, vector<1x128xf32>
    %4 = vector.broadcast %3 : vector<1x128xf32> to vector<16x128xf32>
    %5 = arith.addf %2, %4 : vector<16x128xf32>
    %cst_5 = arith.constant 0.000000e+00 : f32
    %6 = vector.broadcast %cst_5 : f32 to vector<16x128xf32>
    %7 = arith.maximumf %5, %6 : vector<16x128xf32>
    %8 = arith.truncf %7 : vector<16x128xf32> to vector<16x128xbf16>
    %c0_6 = arith.constant 0 : index
    %c0_7 = arith.constant 0 : index
    %9 = vector.load %arg5[%c0_6, %c0_7] : memref<128x128xbf16, #tpu.memory_space<vmem>>, vector<128x128xbf16>
    %cst_8 = arith.constant dense<0.000000e+00> : vector<16x128xf32>
    %10 = tpu.matmul %8, %9, %cst_8 {dimension_numbers = #tpu.dot_dimension_numbers<[1], [0], [0], [1], [0, 0, 1, 1], [], []>} : vector<16x128xbf16>, vector<128x128xbf16>, vector<16x128xf32> -> vector<16x128xf32>
    %c0_i32 = arith.constant 0 : i32
    %11 = arith.cmpi eq, %arg1, %c0_i32 : i32
    %12 = arith.extui %11 : i1 to i32
    %c0_i32_9 = arith.constant 0 : i32
    %13 = arith.cmpi ne, %12, %c0_i32_9 : i32
    scf.if %13 {
      %c0_14 = arith.constant 0 : index
      %c0_15 = arith.constant 0 : index
      %20 = vector.load %arg8[%c0_14, %c0_15] : memref<16x128xf32, #tpu.memory_space<vmem>>, vector<16x128xf32>
      tpu.vector_store %arg8[%c0_14, %c0_15], %10 {strides = array<i32>} : memref<16x128xf32, #tpu.memory_space<vmem>>, vector<16x128xf32>,
    } else {
    }
    %c0_i32_10 = arith.constant 0 : i32
    %14 = arith.cmpi sgt, %arg1, %c0_i32_10 : i32
    %15 = arith.extui %14 : i1 to i32
    %c0_i32_11 = arith.constant 0 : i32
    %16 = arith.cmpi ne, %15, %c0_i32_11 : i32
    scf.if %16 {
      %c0_14 = arith.constant 0 : index
      %c0_15 = arith.constant 0 : index
      %20 = vector.load %arg8[%c0_14, %c0_15] : memref<16x128xf32, #tpu.memory_space<vmem>>, vector<16x128xf32>
      %21 = arith.addf %20, %10 : vector<16x128xf32>
      %c0_16 = arith.constant 0 : index
      %c0_17 = arith.constant 0 : index
      %22 = vector.load %arg8[%c0_16, %c0_17] : memref<16x128xf32, #tpu.memory_space<vmem>>, vector<16x128xf32>
      tpu.vector_store %arg8[%c0_16, %c0_17], %21 {strides = array<i32>} : memref<16x128xf32, #tpu.memory_space<vmem>>, vector<16x128xf32>,
    } else {
    }
    %c0_i32_12 = arith.constant 0 : i32
    %17 = arith.cmpi eq, %arg1, %c0_i32_12 : i32
    %18 = arith.extui %17 : i1 to i32
    %c0_i32_13 = arith.constant 0 : i32
    %19 = arith.cmpi ne, %18, %c0_i32_13 : i32
    scf.if %19 {
      %c0_14 = arith.constant 0 : index
      %c0_15 = arith.constant 0 : index
      %20 = vector.load %arg8[%c0_14, %c0_15] : memref<16x128xf32, #tpu.memory_space<vmem>>, vector<16x128xf32>
      %c0_16 = arith.constant 0 : index
      %c0_17 = arith.constant 0 : index
      %21 = vector.load %arg6[%c0_16, %c0_17] : memref<1x128xf32, #tpu.memory_space<vmem>>, vector<1x128xf32>
      %22 = vector.broadcast %21 : vector<1x128xf32> to vector<16x128xf32>
      %23 = arith.addf %20, %22 : vector<16x128xf32>
      %24 = arith.mulf %23, %23 : vector<16x128xf32>
      %cst_18 = arith.constant dense<0.000000e+00> : vector<16xf32>
      %25 = vector.multi_reduction <add>, %24, %cst_18 [1] : vector<16x128xf32> to vector<16xf32>
      %26 = vector.shape_cast %25 : vector<16xf32> to vector<16x1xf32>
      %cst_19 = arith.constant 1.000000e-24 : f32
      %27 = vector.broadcast %cst_19 : f32 to vector<16x1xf32>
      %28 = arith.maximumf %26, %27 : vector<16x1xf32>
      %29 = math.rsqrt %28 : vector<16x1xf32>
      %30 = vector.broadcast %29 : vector<16x1xf32> to vector<16x128xf32>
      %31 = arith.mulf %23, %30 : vector<16x128xf32>
      %c0_20 = arith.constant 0 : index
      %c0_21 = arith.constant 0 : index
      %32 = vector.load %arg7[%c0_20, %c0_21] : memref<16x128xf32, #tpu.memory_space<vmem>>, vector<16x128xf32>
      tpu.vector_store %arg7[%c0_20, %c0_21], %31 {strides = array<i32>} : memref<16x128xf32, #tpu.memory_space<vmem>>, vector<16x128xf32>,
    } else {
    }
    return
  }
  func.func @transform_0(%arg0: i32, %arg1: i32) -> (i32, i32) {
    %c0_i32 = arith.constant 0 : i32
    %c0_i32_0 = arith.constant 0 : i32
    return %arg0, %c0_i32 : i32, i32
  }
  func.func @transform_1(%arg0: i32, %arg1: i32) -> (i32, i32) {
    %c0_i32 = arith.constant 0 : i32
    %c0_i32_0 = arith.constant 0 : i32
    return %c0_i32, %arg1 : i32, i32
  }
  func.func @transform_2(%arg0: i32, %arg1: i32) -> (i32, i32) {
    %c0_i32 = arith.constant 0 : i32
    %c0_i32_0 = arith.constant 0 : i32
    return %c0_i32, %arg1 : i32, i32
  }
  func.func @transform_3(%arg0: i32, %arg1: i32) -> (i32, i32) {
    %c0_i32 = arith.constant 0 : i32
    %c0_i32_0 = arith.constant 0 : i32
    return %arg1, %c0_i32 : i32, i32
  }
  func.func @transform_4(%arg0: i32, %arg1: i32) -> (i32, i32) {
    %c0_i32 = arith.constant 0 : i32
    %c0_i32_0 = arith.constant 0 : i32
    %c0_i32_1 = arith.constant 0 : i32
    return %c0_i32, %c0_i32_0 : i32, i32
  }
  func.func @transform_5(%arg0: i32, %arg1: i32) -> (i32, i32) {
    %c0_i32 = arith.constant 0 : i32
    %c0_i32_0 = arith.constant 0 : i32
    return %arg0, %c0_i32 : i32, i32
  }
}

</mosaic_0001>

<bundles_post_ra>
// kernel: tpu_custom_call.1
= control target key start
LH: loop header
LB: loop body
LE: loop exit
PB: predicated region body
PF: predicated region fallthrough
CT: control target
= control target key end

     0   :  { %10 = vsyncpa [#allocation4], 0  ;;  %s605_s0 = inlined_call_operand.hbm [shape: bf16[16,128], index: 0, kind: input, shape index: {}]   ;;  %s606_s1 = inlined_call_operand.hbm [shape: bf16[128,128], index: 1, kind: input, shape index: {}]   ;;  %s607_s2 = inlined_call_operand.vmem [shape: f32[1,128], index: 2, kind: input, shape index: {}]   ;;  %s608_s3 = inlined_call_operand.hbm [shape: bf16[128,128], index: 3, kind: input, shape index: {}]   ;;  %s609_s4 = inlined_call_operand.vmem [shape: f32[1,128], index: 4, kind: input, shape index: {}]   ;;  %s610_s5 = inlined_call_operand.hbm [shape: f32[16,128], index: 5, kind: output, shape index: {}]  }
   0x1   :  { %11 = vsyncpa [#allocation7], 0 }
   0x2   :  { %12 = vsyncpa [#allocation5], 0  ;;  %s547_s18 = smov [#allocation6]   ;;  %s548_s20 = smov [#allocation3]  }
   0x3   :  { %s30_s19 = sshll.u32 %s547_s18, 4  ;;  %s18_s21 = sshll.u32 %s548_s20, 4  ;;  %s31_s19 = int_to_ptr.vmem [resolvable:$true] %s30_s19  ;;  %s19_s21 = int_to_ptr.vmem [resolvable:$true] %s18_s21 }
   0x4   :  { %s469_s22 = scalar_lea.vmem %s31_s19, 1024  ;;  %p474_p1 = scmp.lt.s32.totalorder %s31_s19, %s31_s19 }
   0x5   :  { %p470_p0 = scmp.ne.s32.totalorder %s31_s19, %s469_s22  ;;  %p475_p2 = scmp.lt.s32.totalorder %s469_s22, %s469_s22 }
   0x7   :  { %p476_p3 = por %p475_p2, %p474_p1 }
   0x9   :  { %p477_p4 = pnand %p476_p3, %p470_p0 }
   0xb   :  { %480 = shalt.err (!%p477_p4)
}
   0xc   :  { %s549_s23 = smov 64   ;;  %s550_s24 = smov 4  }
   0xd   :  { %36 = dma.hbm_to_vmem [thread:$0]  %s606_s1, 1024, %s31_s19, [#allocation7], %s549_s23, %s549_s23, %s550_s24  }
   0xe   :  { %s489_s27 = scalar_lea.vmem %s19_s21, 128  ;;  %p494_p6 = scmp.lt.s32.totalorder %s19_s21, %s19_s21 }
   0xf   :  { %p490_p5 = scmp.ne.s32.totalorder %s19_s21, %s489_s27  ;;  %p495_p7 = scmp.lt.s32.totalorder %s489_s27, %s489_s27 }
  0x11   :  { %p496_p8 = por %p495_p7, %p494_p6 }
  0x13   :  { %p497_p9 = pnand %p496_p8, %p490_p5 }
  0x15   :  { %500 = shalt.err (!%p497_p9)
}
  0x16   :  { %24 = dma.hbm_to_vmem [thread:$0]  %s605_s0, 128, %s19_s21, [#allocation4], %s549_s23, %s549_s23, %s550_s24  }
  0x17   :  { %s551_s30 = smov [#allocation8]  }
  0x18   :  { %s44_s6 = sshll.u32 %s551_s30, 4  ;;  %s45_s6 = int_to_ptr.vmem [resolvable:$true] %s44_s6 }
  0x19   :  { %s509_s7 = scalar_lea.vmem %s45_s6, 1024  ;;  %p514_p11 = scmp.lt.s32.totalorder %s45_s6, %s45_s6 }
  0x1a   :  { %p510_p10 = scmp.ne.s32.totalorder %s45_s6, %s509_s7  ;;  %p515_p12 = scmp.lt.s32.totalorder %s509_s7, %s509_s7 }
  0x1c   :  { %p516_p13 = por %p515_p12, %p514_p11 }
  0x1e   :  { %p517_p0 = pnand %p516_p13, %p510_p10 }
  0x20   :  { %520 = shalt.err (!%p517_p0)
}
  0x21   :  { %50 = dma.hbm_to_vmem [thread:$0]  %s608_s3, 1024, %s45_s6, [#allocation7], %s549_s23, %s549_s23, %s550_s24  }
  0x22   :  { %541 = dma.done.wait [#allocation4], 128  }
  0x23   :  { %542 = vsyncadd [#allocation4], 4294967168 }
  0x24   :  { %543 = dma.done.wait [#allocation7], 2048  }
  0x25   :  { %544 = vsyncadd [#allocation7], 4294965248  ;;  %v552_v0 = vmov 0.0   ;;  %vm553_vm0 = vmmov 0   ;;  %v440_v1 = vld [vmem:[#allocation6 + $0x38] sm:$0xff]   ;;  %v441_v2 = vld [vmem:[#allocation6 + $0x30] sm:$0xff]  }
  0x26   :  { %390 = vmatprep.subr.bf16.mxu0 %v552_v0  ;;  %406 = vmatprep.mubr.msk.bf16.mxu0 %vm553_vm0, %v552_v0  ;;  %v442_v3 = vld [vmem:[#allocation6 + $0x28] sm:$0xff]   ;;  %v449_v4 = vld [vmem:[#allocation8 + $0x38] sm:$0xff]   ;;  %v443_v5 = vld [vmem:[#allocation6 + $0x20] sm:$0xff]  }
  0x27   :  { %410 = vmatprep.subr.bf16.mxu1 %v552_v0  ;;  %426 = vmatprep.mubr.msk.bf16.mxu1 %vm553_vm0, %v552_v0  ;;  %v450_v6 = vld [vmem:[#allocation8 + $0x30] sm:$0xff]   ;;  %v444_v7 = vld [vmem:[#allocation6 + $0x18] sm:$0xff]   ;;  %v451_v8 = vld [vmem:[#allocation8 + $0x28] sm:$0xff]  }
  0x28   :  { %391 = vmatpush3.bf16.msra.mxu0 %v440_v1  ;;  %411 = vmatpush3.bf16.msra.mxu1 %v449_v4  ;;  %v445_v9 = vld [vmem:[#allocation6 + $0x10] sm:$0xff]   ;;  %v452_v10 = vld [vmem:[#allocation8 + $0x20] sm:$0xff]   ;;  %v446_v11 = vld [vmem:[#allocation6 + $0x8] sm:$0xff]  }
  0x29   :  { %392 = vmatprep.subr.bf16.mxu0 %v552_v0  ;;  %412 = vmatprep.subr.bf16.mxu1 %v552_v0  ;;  %v453_v12 = vld [vmem:[#allocation8 + $0x18] sm:$0xff]   ;;  %v447_v13 = vld [vmem:[#allocation6] sm:$0xff]   ;;  %v454_v15 = vld [vmem:[#allocation8 + $0x10] sm:$0xff]  }
  0x2a   :  { %v448_v14 = vld [vmem:[#allocation3] sm:$0xff]   ;;  %v455_v16 = vld [vmem:[#allocation8 + $0x8] sm:$0xff]   ;;  %v456_v17 = vld [vmem:[#allocation8] sm:$0xff]  }
  0x2b   :  { %v353_v18 = vld [vmem:[%s607_s2] ss:$0 sm:$0xff]  ;;  %s554_s2 = smov [#allocation9]  }
  0x2c   :  { %393 = vmatpush3.bf16.msra.mxu0 %v441_v2  ;;  %413 = vmatpush3.bf16.msra.mxu1 %v450_v6  ;;  %v371_v28 = vld [vmem:[%s609_s4] ss:$0 sm:$0xff]  ;;  %s340_s4 = sshll.u32 %s554_s2, 4  ;;  %s341_s4 = int_to_ptr.vmem [resolvable:$true] %s340_s4 }
  0x2d   :  { %394 = vmatprep.subr.bf16.mxu0 %v552_v0  ;;  %414 = vmatprep.subr.bf16.mxu1 %v552_v0  ;;  %s521_s11 = scalar_lea.vmem %s341_s4, 256  ;;  %p526_p2 = scmp.lt.s32.totalorder %s341_s4, %s341_s4 }
  0x2e   :  { %p522_p1 = scmp.ne.s32.totalorder %s341_s4, %s521_s11  ;;  %p527_p3 = scmp.lt.s32.totalorder %s521_s11, %s521_s11 }
  0x30   :  { %395 = vmatpush3.bf16.msra.mxu0 %v442_v3  ;;  %415 = vmatpush3.bf16.msra.mxu1 %v451_v8  ;;  %p528_p4 = por %p527_p3, %p526_p2 }
  0x31   :  { %396 = vmatprep.subr.bf16.mxu0 %v552_v0  ;;  %416 = vmatprep.subr.bf16.mxu1 %v552_v0 }
  0x32   :  { %p529_p5 = pnand %p528_p4, %p522_p1 }
  0x34   :  { %397 = vmatpush3.bf16.msra.mxu0 %v443_v5  ;;  %417 = vmatpush3.bf16.msra.mxu1 %v452_v10 }
  0x35   :  { %398 = vmatprep.subr.bf16.mxu0 %v552_v0  ;;  %418 = vmatprep.subr.bf16.mxu1 %v552_v0 }
  0x38   :  { %399 = vmatpush3.bf16.msra.mxu0 %v444_v7  ;;  %419 = vmatpush3.bf16.msra.mxu1 %v453_v12 }
  0x39   :  { %400 = vmatprep.subr.bf16.mxu0 %v552_v0  ;;  %420 = vmatprep.subr.bf16.mxu1 %v552_v0 }
  0x3c   :  { %401 = vmatpush3.bf16.msra.mxu0 %v445_v9  ;;  %421 = vmatpush3.bf16.msra.mxu1 %v454_v15 }
  0x3d   :  { %402 = vmatprep.subr.bf16.mxu0 %v552_v0  ;;  %422 = vmatprep.subr.bf16.mxu1 %v552_v0 }
  0x40   :  { %403 = vmatpush3.bf16.msra.mxu0 %v446_v11  ;;  %423 = vmatpush3.bf16.msra.mxu1 %v455_v16 }
  0x41   :  { %404 = vmatprep.subr.bf16.mxu0 %v552_v0  ;;  %424 = vmatprep.subr.bf16.mxu1 %v552_v0 }
  0x44   :  { %405 = vmatpush3.bf16.msra.mxu0 %v447_v13  ;;  %425 = vmatpush3.bf16.msra.mxu1 %v456_v17 }
  0x47   :  { %407 = vmatmul.mubr.bf16.vlgmr.msra.gmra.mxu0 %v448_v14 }
 0x107   :  { %v176_v19 = vpop.f32.mrf.mxu0 }
 0x108   :  { %v177_v21 = vadd.f32 %v353_v18, %v176_v19 }
 0x109   :  { %v408_v20 = vpop.f32.mrf.mxu0 }
 0x10a   :  { %v183_v25 = vmax.f32 %v177_v21, 0.0 }
 0x10b   :  { %v179_v22 = vpop.f32.mrf.mxu0 }
 0x10c   :  { %v180_v23 = vadd.f32 %v353_v18, %v179_v22 }
 0x10d   :  { %v409_v24 = vpop.f32.mrf.mxu0 }
 0x10e   :  { %v184_v26 = vmax.f32 %v180_v23, 0.0 }
 0x110   :  { %v185_v27 = vpack.c.bf16 %v184_v26, %v183_v25 }
 0x112   :  { %427 = vmatmul.mubr.bf16.vlgmr.msra.gmra.mxu1 %v185_v27 }
 0x1d2   :  { %v284_v29 = vpop.f32.mrf.mxu1 }
 0x1d3   :  { %v319_v30 = vadd.f32 %v371_v28, %v284_v29 }
 0x1d4   :  { %v428_v31 = vpop.f32.mrf.mxu1 }
 0x1d5   :  { %v321_v32 = vmul.f32 %v319_v30, %v319_v30 }
 0x1d6   :  { %v287_v33 = vpop.f32.mrf.mxu1 }
 0x1d7   :  { %v320_v34 = vadd.f32 %v371_v28, %v287_v33  ;;  %323 = vadd.xlane.f32.xlu0 %v321_v32 }
 0x1d8   :  { %v429_v35 = vpop.f32.mrf.mxu1 }
 0x1d9   :  { %v322_v36 = vmul.f32 %v320_v34, %v320_v34 }
 0x1db   :  { %325 = vadd.xlane.f32.xlu0 %v322_v36 }
 0x260   :  { %v324_v37 = vpop.xlane.xlu0 %323 }
 0x261   :  { %v327_v38 = vmax.f32 %v324_v37, 1e-24 }
 0x263   :  { %457 = vrsqrt.f32 %v327_v38 }
 0x264   :  { %v326_v39 = vpop.xlane.xlu0 %325 }
 0x265   :  { %v328_v40 = vmax.f32 %v326_v39, 1e-24 }
 0x267   :  { %459 = vrsqrt.f32 %v328_v40 }
 0x270   :  { %v458_v41 = vpop.eup %457 }
 0x271   :  { %v331_v42 = vmul.f32 %v458_v41, %v319_v30 }
 0x273   :  { %333 = vst [vmem:[#allocation9] sm:$0xff] %v331_v42 }
 0x274   :  { %v460_v43 = vpop.eup %459 }
 0x275   :  { %v332_v44 = vmul.f32 %v460_v43, %v320_v34 }
 0x277   :  { %334 = vst [vmem:[#allocation9 + $0x8] sm:$0xff] %v332_v44 }
 0x278   :  { %532 = shalt.err (!%p529_p5)
}
 0x279   :  { %s555_s12 = smov 128   ;;  %s556_s13 = smov 8  }
 0x27a   :  { %346 = dma.vmem_to_hbm [thread:$0]  %s341_s4, 256, %s610_s5, [#allocation5], %s555_s12, %s555_s12, %s556_s13  }
 0x27b   :  { %545 = dma.done.wait [#allocation5], 256  }
 0x27c   :  { %546 = vsyncadd [#allocation5], 4294967040 }
 0x27d   :  { %350 = vsyncpa [#allocation4], 1 }
 0x27e   :  { %351 = vsyncpa [#allocation7], 1 }
 0x27f   :  { %352 = vsyncpa [#allocation5], 1 }

</bundles_post_ra>
